<compile_context>
chip_gen: v5e
topology: v5e:2x2
jax: 0.10.0
libtpu: 0.0.40
codegen_flags: <defaults>
</compile_context>

<pallas_src>
import math
import functools

import jax
import jax.numpy as jnp
from jax import lax
from jax.experimental import pallas as pl
from jax.experimental.pallas import tpu as pltpu


def _attention_kernel(x_ref, wk_ref, bk_ref, wq_ref, bq_ref, wv_ref, bv_ref,
                      mask_ref, o_ref, *, sqrt_k, compute_dtype, approx_recip):
    Bb, T, D = x_ref.shape
    N = Bb * T

    x = x_ref[...]                       # (Bb, T, D) f32 — residual copy stays f32
    x2d = x.reshape(N, D)                # T == 8 sublane tile -> layout-free merge
    xm = x2d.astype(compute_dtype)       # matmul operand (bf16 on the fast path)

    # Three separate projections: no sub-vreg lane slicing of a fused result.
    keys = jnp.dot(xm, wk_ref[...], preferred_element_type=jnp.float32) + bk_ref[...]
    queries = jnp.dot(xm, wq_ref[...], preferred_element_type=jnp.float32) + bq_ref[...]
    values = jnp.dot(xm, wv_ref[...], preferred_element_type=jnp.float32) + bv_ref[...]

    # Flattened, transposed logits over the whole (Bb*T) axis — ONE MXU matmul
    # instead of Bb tiny batched ones:
    #   L[r, c] = <key_r, query_c>,  r = (b, j) key row, c = (b', i) query col.
    L = lax.dot_general(keys.astype(compute_dtype), queries.astype(compute_dtype),
                        dimension_numbers=(((1,), (1,)), ((), ())),
                        preferred_element_type=jnp.float32)          # (N, N)

    # Block-diagonal causal additive mask (0 where same batch and j <= i,
    # -1e30 elsewhere).  The module's softmax over the QUERY axis (PyTorch
    # dim=1) is thus a plain lane (axis=-1) reduce; every row has at least one
    # in-block valid entry (i = j), so off-block/-masked entries underflow to
    # exactly 0 after the row-max subtraction.
    L = L + mask_ref[...]

    m = jnp.max(L, axis=-1, keepdims=True)
    p = jnp.exp(L - m)
    s = jnp.sum(p, axis=-1, keepdims=True)
    # softmax normalisation and the post-softmax 1/sqrt(k) fold into one
    # reciprocal of the tiny (N, 1) column (EUP slot on the fast path).
    probs_t = p * pl.reciprocal(s * sqrt_k, approx=approx_recip)     # (N, N)

    # read[c, v] = sum_r probs_t[r, c] * values[r, v]  (contract the key axis;
    # off-block probabilities are exactly zero, so one matmul covers all Bb
    # batches at once).
    read = lax.dot_general(probs_t.astype(compute_dtype), values.astype(compute_dtype),
                           dimension_numbers=(((0,), (0,)), ((), ())),
                           preferred_element_type=jnp.float32)       # (N, V)

    out = x2d + read                     # residual add (V == D), f32
    o_ref[...] = out.reshape(Bb, T, D).astype(o_ref.dtype)   # direct (Bb,T,D) store


def _tensorcores_per_device():
    """2 only for chips exposing 2 TensorCores to one device (v4/v5p megacore,
    v7x); v5e/v6e are single-TC so splitting the grid is pure overhead."""
    try:
        kind = jax.devices()[0].device_kind.lower()
    except Exception:
        return 1
    if "7x" in kind or "v7" in kind or "v4" in kind or "v5p" in kind:
        return 2
    return 1


def _pick_batch_block(B, num_tc):
    """Single-TC: whole batch per step (grid=(1,)).  2-TC: largest divisor of
    B that still leaves >= num_tc 'parallel' grid steps."""
    if num_tc <= 1:
        return B
    best = 1
    for d in range(1, B + 1):
        if B % d == 0 and B // d >= num_tc:
            best = d
    return best


@functools.partial(jax.jit,
                   static_argnames=("k_size", "batch_block", "fast",
                                    "vmem_limit_bytes"))
def _attention_block_impl(x, wk, bk, wq, bq, wv, bv, *, k_size, batch_block,
                          fast, vmem_limit_bytes=None):
    B, T, D = x.shape
    K = wk.shape[1]
    V = wv.shape[1]
    assert V == D, "residual add requires v_size == dims"
    assert K == k_size
    assert B % batch_block == 0
    nb = B // batch_block
    N = batch_block * T

    compute_dtype = jnp.bfloat16 if fast else jnp.float32

    # Weights cast once in the (jitted) wrapper -> bf16 HBM->VMEM blocks on the
    # fast path, no per-step weight casts in the kernel.  Biases stay f32.
    # x stays f32 so the residual copy is exact; it is cast in-kernel only for
    # the matmul operand.
    wk_c = wk.astype(compute_dtype)
    wq_c = wq.astype(compute_dtype)
    wv_c = wv.astype(compute_dtype)

    # Block-diagonal causal additive mask over the flattened (Bb*T) axis, in
    # the transposed (key row, query column) orientation: valid iff same batch
    # and key_j <= query_i.  Finite -1e30 (robust; underflows to exact 0).
    # Constant-folded / fused under jit — no per-call Python dispatch.
    r = jnp.arange(N)
    same_batch = (r[:, None] // T) == (r[None, :] // T)
    causal = (r[:, None] % T) <= (r[None, :] % T)
    mask_t = jnp.where(same_batch & causal, 0.0, -1e30).astype(jnp.float32)

    kernel = functools.partial(_attention_kernel,
                               sqrt_k=math.sqrt(k_size),
                               compute_dtype=compute_dtype,
                               approx_recip=fast)

    cp_kwargs = dict(dimension_semantics=("parallel",))
    if vmem_limit_bytes is not None:
        # e.g. on v6e raise toward the 128 MiB physical VMEM for larger T
        # before resorting to flash-style key-axis tiling.
        cp_kwargs["vmem_limit_bytes"] = vmem_limit_bytes

    return pl.pallas_call(
        kernel,
        out_shape=jax.ShapeDtypeStruct((B, T, D), x.dtype),
        grid=(nb,),
        in_specs=[
            pl.BlockSpec((batch_block, T, D), lambda b: (b, 0, 0)),   # x (f32)
            pl.BlockSpec((D, K), lambda b: (0, 0)),                   # Wk
            pl.BlockSpec((1, K), lambda b: (0, 0)),                   # bk
            pl.BlockSpec((D, K), lambda b: (0, 0)),                   # Wq
            pl.BlockSpec((1, K), lambda b: (0, 0)),                   # bq
            pl.BlockSpec((D, V), lambda b: (0, 0)),                   # Wv
            pl.BlockSpec((1, V), lambda b: (0, 0)),                   # bv
            pl.BlockSpec((N, N), lambda b: (0, 0)),                   # additive mask
        ],
        out_specs=pl.BlockSpec((batch_block, T, D), lambda b: (b, 0, 0)),
        compiler_params=pltpu.CompilerParams(**cp_kwargs),
    )(x, wk_c, bk, wq_c, bq, wv_c, bv, mask_t)


def attention_block(x, wk, bk, wq, bq, wv, bv, k_size, *,
                    batch_block=None, fast=True, vmem_limit_bytes=None):
    """Pallas TPU forward of AttentionBlock.

    Weights are stored transposed ((in, out)); biases are (1, out).
    Requires v_size == dims (the module's residual add demands it).
    fast=True  -> bf16 MXU operands + approx EUP reciprocal (f32 accumulate).
    fast=False -> bit-faithful f32 path for verification.
    """
    if batch_block is None:
        batch_block = _pick_batch_block(x.shape[0], _tensorcores_per_device())
    return _attention_block_impl(x, wk, bk, wq, bq, wv, bv, k_size=k_size,
                                 batch_block=batch_block, fast=fast,
                                 vmem_limit_bytes=vmem_limit_bytes)


def attention_block_ref(x, wk, bk, wq, bq, wv, bv, k_size):
    """Pure-JAX reference replicating the PyTorch forward exactly."""
    keys = x @ wk + bk
    queries = x @ wq + bq
    values = x @ wv + bv
    logits = jnp.einsum("btk,bsk->bts", queries, keys)
    T = logits.shape[1]
    mask = jnp.triu(jnp.ones((T, T), dtype=bool), k=1)
    logits = jnp.where(mask[None], -jnp.inf, logits)
    probs = jax.nn.softmax(logits, axis=1) / math.sqrt(k_size)
    read = jnp.einsum("bts,bsv->btv", probs, values)
    return x + read


if __name__ == "__main__":
    def make_params(key, D, K, V):
        k1, k2, k3, k4, k5, k6 = jax.random.split(key, 6)
        bound = 1.0 / math.sqrt(D)
        wk = jax.random.uniform(k1, (D, K), jnp.float32, -bound, bound)
        bk = jax.random.uniform(k2, (1, K), jnp.float32, -bound, bound)
        wq = jax.random.uniform(k3, (D, K), jnp.float32, -bound, bound)
        bq = jax.random.uniform(k4, (1, K), jnp.float32, -bound, bound)
        wv = jax.random.uniform(k5, (D, V), jnp.float32, -bound, bound)
        bv = jax.random.uniform(k6, (1, V), jnp.float32, -bound, bound)
        return wk, bk, wq, bq, wv, bv

    key = jax.random.PRNGKey(0)
    kx, kp = jax.random.split(key)

    # Config 1: B*T = 64 MXU rows in a single grid step on 1-TC chips.
    B, T, D, K = 8, 8, 32, 16
    V = D
    x = jax.random.normal(kx, (B, T, D), dtype=jnp.float32)
    wk, bk, wq, bq, wv, bv = make_params(kp, D, K, V)
    ref = attention_block_ref(x, wk, bk[0], wq, bq[0], wv, bv[0], K)

    # Exact path (f32 MXU operands, exact reciprocal): tight check vs reference.
    out_exact = jax.block_until_ready(
        attention_block(x, wk, bk, wq, bq, wv, bv, K, fast=False))
    assert out_exact.shape == (B, T, D)
    assert jnp.allclose(out_exact, ref, atol=1e-5, rtol=1e-5), "exact path mismatch"

    # Fast path (bf16 MXU operands, approx EUP reciprocal): mixed-precision tol.
    out_fast = jax.block_until_ready(
        attention_block(x, wk, bk, wq, bq, wv, bv, K, fast=True))
    assert out_fast.shape == (B, T, D)
    assert jnp.allclose(out_fast, ref, atol=0.25, rtol=0.05), "fast path mismatch"

    # Explicit 2-step grid (batch_block=4) exercises the multi-step 'parallel'
    # path and the block-diagonal mask at a different N, on any chip.
    out_split = jax.block_until_ready(
        attention_block(x, wk, bk, wq, bq, wv, bv, K, batch_block=4, fast=False))
    assert jnp.allclose(out_split, ref, atol=1e-5, rtol=1e-5), "split-grid mismatch"

    # Config 2: tiny batch exercises the degenerate block size.
    B2 = 2
    x2 = x[:B2]
    ref2 = attention_block_ref(x2, wk, bk[0], wq, bq[0], wv, bv[0], K)
    out2 = jax.block_until_ready(
        attention_block(x2, wk, bk, wq, bq, wv, bv, K, fast=False))
    assert out2.shape == (B2, T, D)
    assert jnp.allclose(out2, ref2, atol=1e-5, rtol=1e-5), "small-batch mismatch"

    print("KERNEL_OK")
</pallas_src>

<mosaic_0001>
module attributes {stable_mosaic.version = 11 : i64} {
  func.func @_attention_kernel(%arg0: i32, %arg1: memref<8x8x32xf32, #tpu.memory_space<vmem>>, %arg2: memref<32x16xf32, #tpu.memory_space<vmem>>, %arg3: memref<1x16xf32, #tpu.memory_space<vmem>>, %arg4: memref<32x16xf32, #tpu.memory_space<vmem>>, %arg5: memref<1x16xf32, #tpu.memory_space<vmem>>, %arg6: memref<32x32xf32, #tpu.memory_space<vmem>>, %arg7: memref<1x32xf32, #tpu.memory_space<vmem>>, %arg8: memref<64x64xf32, #tpu.memory_space<vmem>>, %arg9: memref<8x8x32xf32, #tpu.memory_space<vmem>>) attributes {dimension_semantics = [#tpu.dimension_semantics<parallel>], iteration_bounds = array<i64: 1>, scalar_prefetch = 0 : i64, scratch_operands = 0 : i64, tpu.core_type = #tpu.core_type<tc>, window_params = [{transform_indices = @transform_0, window_bounds = array<i64: 8, 8, 32>}, {pipeline_mode = #tpu.pipeline_mode<synchronous>, transform_indices = @transform_1, window_bounds = array<i64: 32, 16>}, {pipeline_mode = #tpu.pipeline_mode<synchronous>, transform_indices = @transform_2, window_bounds = array<i64: 1, 16>}, {pipeline_mode = #tpu.pipeline_mode<synchronous>, transform_indices = @transform_3, window_bounds = array<i64: 32, 16>}, {pipeline_mode = #tpu.pipeline_mode<synchronous>, transform_indices = @transform_4, window_bounds = array<i64: 1, 16>}, {pipeline_mode = #tpu.pipeline_mode<synchronous>, transform_indices = @transform_5, window_bounds = array<i64: 32, 32>}, {pipeline_mode = #tpu.pipeline_mode<synchronous>, transform_indices = @transform_6, window_bounds = array<i64: 1, 32>}, {pipeline_mode = #tpu.pipeline_mode<synchronous>, transform_indices = @transform_7, window_bounds = array<i64: 64, 64>}, {transform_indices = @transform_8, window_bounds = array<i64: 8, 8, 32>}]} {
    %c0 = arith.constant 0 : index
    %c0_0 = arith.constant 0 : index
    %c0_1 = arith.constant 0 : index
    %0 = vector.load %arg1[%c0, %c0_0, %c0_1] : memref<8x8x32xf32, #tpu.memory_space<vmem>>, vector<8x8x32xf32>
    %1 = vector.shape_cast %0 : vector<8x8x32xf32> to vector<64x32xf32>
    %c0_2 = arith.constant 0 : index
    %c0_3 = arith.constant 0 : index
    %2 = vector.load %arg2[%c0_2, %c0_3] : memref<32x16xf32, #tpu.memory_space<vmem>>, vector<32x16xf32>
    %cst = arith.constant dense<0.000000e+00> : vector<64x16xf32>
    %3 = tpu.matmul %1, %2, %cst {dimension_numbers = #tpu.dot_dimension_numbers<[1], [0], [0], [1], [0, 0, 1, 1], [], []>} : vector<64x32xf32>, vector<32x16xf32>, vector<64x16xf32> -> vector<64x16xf32>
    %c0_4 = arith.constant 0 : index
    %c0_5 = arith.constant 0 : index
    %4 = vector.load %arg3[%c0_4, %c0_5] : memref<1x16xf32, #tpu.memory_space<vmem>>, vector<1x16xf32>
    %5 = vector.broadcast %4 : vector<1x16xf32> to vector<64x16xf32>
    %6 = arith.addf %3, %5 : vector<64x16xf32>
    %c0_6 = arith.constant 0 : index
    %c0_7 = arith.constant 0 : index
    %7 = vector.load %arg4[%c0_6, %c0_7] : memref<32x16xf32, #tpu.memory_space<vmem>>, vector<32x16xf32>
    %cst_8 = arith.constant dense<0.000000e+00> : vector<64x16xf32>
    %8 = tpu.matmul %1, %7, %cst_8 {dimension_numbers = #tpu.dot_dimension_numbers<[1], [0], [0], [1], [0, 0, 1, 1], [], []>} : vector<64x32xf32>, vector<32x16xf32>, vector<64x16xf32> -> vector<64x16xf32>
    %c0_9 = arith.constant 0 : index
    %c0_10 = arith.constant 0 : index
    %9 = vector.load %arg5[%c0_9, %c0_10] : memref<1x16xf32, #tpu.memory_space<vmem>>, vector<1x16xf32>
    %10 = vector.broadcast %9 : vector<1x16xf32> to vector<64x16xf32>
    %11 = arith.addf %8, %10 : vector<64x16xf32>
    %c0_11 = arith.constant 0 : index
    %c0_12 = arith.constant 0 : index
    %12 = vector.load %arg6[%c0_11, %c0_12] : memref<32x32xf32, #tpu.memory_space<vmem>>, vector<32x32xf32>
    %cst_13 = arith.constant dense<0.000000e+00> : vector<64x32xf32>
    %13 = tpu.matmul %1, %12, %cst_13 {dimension_numbers = #tpu.dot_dimension_numbers<[1], [0], [0], [1], [0, 0, 1, 1], [], []>} : vector<64x32xf32>, vector<32x32xf32>, vector<64x32xf32> -> vector<64x32xf32>
    %c0_14 = arith.constant 0 : index
    %c0_15 = arith.constant 0 : index
    %14 = vector.load %arg7[%c0_14, %c0_15] : memref<1x32xf32, #tpu.memory_space<vmem>>, vector<1x32xf32>
    %15 = vector.broadcast %14 : vector<1x32xf32> to vector<64x32xf32>
    %16 = arith.addf %13, %15 : vector<64x32xf32>
    %cst_16 = arith.constant dense<0.000000e+00> : vector<64x64xf32>
    %17 = tpu.matmul %6, %11, %cst_16 {dimension_numbers = #tpu.dot_dimension_numbers<[1], [1], [0], [0], [0, 0, 1, 0], [], []>} : vector<64x16xf32>, vector<64x16xf32>, vector<64x64xf32> -> vector<64x64xf32>
    %c0_17 = arith.constant 0 : index
    %c0_18 = arith.constant 0 : index
    %18 = vector.load %arg8[%c0_17, %c0_18] : memref<64x64xf32, #tpu.memory_space<vmem>>, vector<64x64xf32>
    %19 = arith.addf %17, %18 : vector<64x64xf32>
    %cst_19 = arith.constant dense<0xFF800000> : vector<64xf32>
    %20 = vector.multi_reduction <maximumf>, %19, %cst_19 [1] : vector<64x64xf32> to vector<64xf32>
    %21 = vector.shape_cast %20 : vector<64xf32> to vector<64x1xf32>
    %22 = vector.broadcast %21 : vector<64x1xf32> to vector<64x64xf32>
    %23 = arith.subf %19, %22 : vector<64x64xf32>
    %24 = math.exp %23 : vector<64x64xf32>
    %cst_20 = arith.constant dense<0.000000e+00> : vector<64xf32>
    %25 = vector.multi_reduction <add>, %24, %cst_20 [1] : vector<64x64xf32> to vector<64xf32>
    %26 = vector.shape_cast %25 : vector<64xf32> to vector<64x1xf32>
    %cst_21 = arith.constant 4.000000e+00 : f32
    %27 = vector.broadcast %cst_21 : f32 to vector<64x1xf32>
    %28 = arith.mulf %26, %27 : vector<64x1xf32>
    %29 = tpu.reciprocal %28 : vector<64x1xf32> -> vector<64x1xf32>
    %30 = vector.broadcast %29 : vector<64x1xf32> to vector<64x64xf32>
    %31 = arith.mulf %24, %30 : vector<64x64xf32>
    %cst_22 = arith.constant dense<0.000000e+00> : vector<64x32xf32>
    %32 = tpu.matmul %31, %16, %cst_22 {dimension_numbers = #tpu.dot_dimension_numbers<[0], [0], [1], [1], [0, 1, 1, 1], [], []>} : vector<64x64xf32>, vector<64x32xf32>, vector<64x32xf32> -> vector<64x32xf32>
    %33 = arith.addf %1, %32 : vector<64x32xf32>
    %34 = vector.shape_cast %33 : vector<64x32xf32> to vector<8x8x32xf32>
    %c0_23 = arith.constant 0 : index
    %c0_24 = arith.constant 0 : index
    %c0_25 = arith.constant 0 : index
    %35 = vector.load %arg9[%c0_23, %c0_24, %c0_25] : memref<8x8x32xf32, #tpu.memory_space<vmem>>, vector<8x8x32xf32>
    tpu.vector_store %arg9[%c0_23, %c0_24, %c0_25], %34 {strides = array<i32>} : memref<8x8x32xf32, #tpu.memory_space<vmem>>, vector<8x8x32xf32>,
    return
  }
  func.func @transform_0(%arg0: i32) -> (i32, i32, i32) {
    %c0_i32 = arith.constant 0 : i32
    %c0_i32_0 = arith.constant 0 : i32
    %c0_i32_1 = arith.constant 0 : i32
    return %arg0, %c0_i32, %c0_i32_0 : i32, i32, i32
  }
  func.func @transform_1(%arg0: i32) -> (i32, i32) {
    %c0_i32 = arith.constant 0 : i32
    %c0_i32_0 = arith.constant 0 : i32
    %c0_i32_1 = arith.constant 0 : i32
    return %c0_i32, %c0_i32_0 : i32, i32
  }
  func.func @transform_2(%arg0: i32) -> (i32, i32) {
    %c0_i32 = arith.constant 0 : i32
    %c0_i32_0 = arith.constant 0 : i32
    %c0_i32_1 = arith.constant 0 : i32
    return %c0_i32, %c0_i32_0 : i32, i32
  }
  func.func @transform_3(%arg0: i32) -> (i32, i32) {
    %c0_i32 = arith.constant 0 : i32
    %c0_i32_0 = arith.constant 0 : i32
    %c0_i32_1 = arith.constant 0 : i32
    return %c0_i32, %c0_i32_0 : i32, i32
  }
  func.func @transform_4(%arg0: i32) -> (i32, i32) {
    %c0_i32 = arith.constant 0 : i32
    %c0_i32_0 = arith.constant 0 : i32
    %c0_i32_1 = arith.constant 0 : i32
    return %c0_i32, %c0_i32_0 : i32, i32
  }
  func.func @transform_5(%arg0: i32) -> (i32, i32) {
    %c0_i32 = arith.constant 0 : i32
    %c0_i32_0 = arith.constant 0 : i32
    %c0_i32_1 = arith.constant 0 : i32
    return %c0_i32, %c0_i32_0 : i32, i32
  }
  func.func @transform_6(%arg0: i32) -> (i32, i32) {
    %c0_i32 = arith.constant 0 : i32
    %c0_i32_0 = arith.constant 0 : i32
    %c0_i32_1 = arith.constant 0 : i32
    return %c0_i32, %c0_i32_0 : i32, i32
  }
  func.func @transform_7(%arg0: i32) -> (i32, i32) {
    %c0_i32 = arith.constant 0 : i32
    %c0_i32_0 = arith.constant 0 : i32
    %c0_i32_1 = arith.constant 0 : i32
    return %c0_i32, %c0_i32_0 : i32, i32
  }
  func.func @transform_8(%arg0: i32) -> (i32, i32, i32) {
    %c0_i32 = arith.constant 0 : i32
    %c0_i32_0 = arith.constant 0 : i32
    %c0_i32_1 = arith.constant 0 : i32
    return %arg0, %c0_i32, %c0_i32_0 : i32, i32, i32
  }
}

</mosaic_0001>

<bundles_post_ra>
// kernel: _attention_block_impl.1
= control target key start
LH: loop header
LB: loop body
LE: loop exit
PB: predicated region body
PF: predicated region fallthrough
CT: control target
= control target key end

     0   :  { %vm46_vm0 = vcmask 261120   ;;  %s1080_s0 = inlined_call_operand.vmem [shape: f32[8,8,32], index: 0, kind: input, shape index: {}]   ;;  %s1081_s1 = inlined_call_operand.vmem [shape: f32[32,16], index: 1, kind: input, shape index: {}]   ;;  %s1082_s2 = inlined_call_operand.vmem [shape: f32[1,16], index: 2, kind: input, shape index: {}]   ;;  %s1083_s3 = inlined_call_operand.vmem [shape: f32[32,16], index: 3, kind: input, shape index: {}]   ;;  %s1084_s4 = inlined_call_operand.vmem [shape: f32[1,16], index: 4, kind: input, shape index: {}]   ;;  %s1085_s5 = inlined_call_operand.vmem [shape: f32[32,32], index: 5, kind: input, shape index: {}]   ;;  %s1086_s6 = inlined_call_operand.vmem [shape: f32[1,32], index: 6, kind: input, shape index: {}]   ;;  %s1087_s7 = inlined_call_operand.vmem [shape: f32[64,64], index: 7, kind: input, shape index: {}]   ;;  %s1088_s8 = inlined_call_operand.hbm [shape: f32[8,8,32], index: 8, kind: output, shape index: {}]  }
   0x1   :  { %v41_v0 = vld [vmem:[%s1081_s1 + $0x18] sm:$0xff]  ;;  %v40_v1 = vld [vmem:[%s1081_s1 + $0x10] sm:$0xff]  ;;  %v39_v2 = vld [vmem:[%s1081_s1 + $0x8] sm:$0xff] }
   0x2   :  { %688 = vmatpush.msra.mxu1 %v41_v0  ;;  %83 = vmatpush.msra.mxu0 %v41_v0  ;;  %v38_v3 = vld [vmem:[%s1081_s1] sm:$0xff]  ;;  %v824_v4 = vld [vmem:[%s1080_s0 + $0x18] sm:$0xff] }
   0x3   :  { %689 = vmatpush.msra.mxu2 %v41_v0 }
   0x4   :  { %690 = vmatpush.msra.mxu1 %v40_v1  ;;  %84 = vmatpush.msra.mxu0 %v40_v1 }
   0x5   :  { %691 = vmatpush.msra.mxu2 %v40_v1 }
   0x6   :  { %692 = vmatpush.msra.mxu1 %v39_v2  ;;  %85 = vmatpush.msra.mxu0 %v39_v2 }
   0x7   :  { %13 = vsyncpa [#allocation3], 0  ;;  %v115_v5 = vld [vmem:[%s1083_s3 + $0x18] sm:$0xff]  ;;  %693 = vmatpush.msra.mxu2 %v39_v2  ;;  %v832_v6 = vld [vmem:[%s1080_s0] sm:$0xff]  ;;  %vm218_vm1 = vcmask 130048   ;;  %vm308_vm2 = vcmask 523264  }
   0x8   :  { %694 = vmatpush.msra.mxu1 %v38_v3  ;;  %86 = vmatpush.msra.mxu0 %v38_v3  ;;  %v114_v7 = vld [vmem:[%s1083_s3 + $0x10] sm:$0xff]  ;;  %v113_v8 = vld [vmem:[%s1083_s3 + $0x8] sm:$0xff]  ;;  %v112_v9 = vld [vmem:[%s1083_s3] sm:$0xff]  ;;  %s762_s15 = smov 128   ;;  %s763_s16 = smov 8  }
   0x9   :  { %643 = vmatmul.msk.f32.vlgmr.msra.gmra.mxu1 %vm46_vm0, %v824_v4  ;;  %640 = vmatmul.msk.f32.vlgmr.msra.gmra.mxu0 %vm46_vm0, %v832_v6  ;;  %v850_v10 = vld [vmem:[%s1080_s0 + $0x20] sm:$0xff]  ;;  %v855_v11 = vld [vmem:[%s1080_s0 + $0x8] sm:$0xff]  ;;  %v869_v13 = vld [vmem:[%s1080_s0 + $0x10] sm:$0xff] }
   0xa   :  { %132 = vmatpush.msrb.mxu1 %v115_v5  ;;  %695 = vmatpush.msra.mxu2 %v38_v3  ;;  %v864_v12 = vld [vmem:[%s1080_s0 + $0x28] sm:$0xff]  ;;  %v882_v14 = vld [vmem:[%s1080_s0 + $0x30] sm:$0xff]  ;;  %v891_v15 = vld [vmem:[%s1080_s0 + $0x38] sm:$0xff] }
   0xb   :  { %646 = vmatmul.msk.f32.vlgmr.msra.gmra.mxu2 %vm46_vm0, %v882_v14  ;;  %v701_v26 = vld [vmem:[%s1084_s4] ss:$0 sm:$0xff]  ;;  %v211_v54 = vld [vmem:[%s1087_s7 + $0x8] sm:$0xff]  ;;  %v212_v58 = vld [vmem:[%s1087_s7 + $0x10] sm:$0xff] }
   0xc   :  { %133 = vmatpush.msrb.mxu1 %v114_v7  ;;  %v700_v36 = vld [vmem:[%s1082_s2] ss:$0 sm:$0xff]  ;;  %v213_v62 = vld [vmem:[%s1087_s7 + $0x18] sm:$0xff]  ;;  %s628_s2 = sshll.u32 %s1088_s8, 4  ;;  %s629_s2 = int_to_ptr.hbm [resolvable:$true] %s628_s2 }
   0xd   :  { %v210_v50 = vld [vmem:[%s1087_s7] sm:$0xff] }
   0xe   :  { %134 = vmatpush.msrb.mxu1 %v113_v8  ;;  %v214_v2 = vld [vmem:[%s1087_s7 + $0x20] sm:$0xff]  ;;  %v215_v8 = vld [vmem:[%s1087_s7 + $0x28] sm:$0xff] }
  0x10   :  { %135 = vmatpush.msrb.mxu1 %v112_v9 }
  0x11   :  { %644 = vmatmul.msk.f32.gmra.mxu1 %vm46_vm0, %v850_v10  ;;  %641 = vmatmul.msk.f32.gmra.mxu0 %vm46_vm0, %v855_v11 }
  0x13   :  { %647 = vmatmul.msk.f32.gmra.mxu2 %vm46_vm0, %v891_v15 }
  0x19   :  { %645 = vmatmul.msk.f32.gmra.mxu1 %vm46_vm0, %v864_v12  ;;  %642 = vmatmul.msk.f32.gmra.mxu0 %vm46_vm0, %v869_v13 }
  0x21   :  { %648 = vmatmul.msk.f32.vlgmr.msrb.gmra.mxu1 %vm46_vm0, %v832_v6 }
  0x29   :  { %649 = vmatmul.msk.f32.gmra.mxu1 %vm46_vm0, %v855_v11 }
  0x31   :  { %650 = vmatmul.msk.f32.gmra.mxu1 %vm46_vm0, %v869_v13 }
  0x39   :  { %651 = vmatmul.msk.f32.gmra.mxu1 %vm46_vm0, %v824_v4 }
  0x41   :  { %652 = vmatmul.msk.f32.gmra.mxu1 %vm46_vm0, %v850_v10 }
  0x49   :  { %653 = vmatmul.msk.f32.gmra.mxu1 %vm46_vm0, %v864_v12 }
  0x51   :  { %654 = vmatmul.msk.f32.gmra.mxu1 %vm46_vm0, %v882_v14 }
  0x59   :  { %655 = vmatmul.msk.f32.gmra.mxu1 %vm46_vm0, %v891_v15 }
  0x86   :  { %v97_v16 = vpop.f32.mrf.mxu1  ;;  %v88_v34 = vpop.f32.mrf.mxu0 }
  0x87   :  { %v89_v38 = vadd.f32 %v700_v36, %v88_v34  ;;  %v98_v43 = vadd.f32 %v700_v36, %v97_v16 }
  0x8e   :  { %v100_v17 = vpop.f32.mrf.mxu1  ;;  %v91_v39 = vpop.f32.mrf.mxu0 }
  0x8f   :  { %v92_v40 = vadd.f32 %v700_v36, %v91_v39  ;;  %v101_v44 = vadd.f32 %v700_v36, %v100_v17  ;;  %v106_v46 = vpop.f32.mrf.mxu2 }
  0x90   :  { %v107_v47 = vadd.f32 %v700_v36, %v106_v46 }
  0x96   :  { %v103_v18 = vpop.f32.mrf.mxu1  ;;  %v94_v41 = vpop.f32.mrf.mxu0 }
  0x97   :  { %v95_v42 = vadd.f32 %v700_v36, %v94_v41  ;;  %v104_v45 = vadd.f32 %v700_v36, %v103_v18  ;;  %v109_v48 = vpop.f32.mrf.mxu2  ;;  %v216_v18 = vld [vmem:[%s1087_s7 + $0x30] sm:$0xff] }
  0x98   :  { %v110_v49 = vadd.f32 %v700_v36, %v109_v48 }
  0x9e   :  { %v137_v19 = vpop.f32.mrf.mxu1 }
  0x9f   :  { %v138_v37 = vadd.f32 %v701_v26, %v137_v19 }
  0xa6   :  { %v140_v20 = vpop.f32.mrf.mxu1 }
  0xa7   :  { %v141_v35 = vadd.f32 %v701_v26, %v140_v20 }
  0xae   :  { %v143_v21 = vpop.f32.mrf.mxu1 }
  0xaf   :  { %v144_v33 = vadd.f32 %v701_v26, %v143_v21 }
  0xb6   :  { %v146_v22 = vpop.f32.mrf.mxu1 }
  0xb7   :  { %v147_v32 = vadd.f32 %v701_v26, %v146_v22  ;;  %v217_v22 = vld [vmem:[%s1087_s7 + $0x38] sm:$0xff] }
  0xbe   :  { %v149_v23 = vpop.f32.mrf.mxu1 }
  0xbf   :  { %v150_v31 = vadd.f32 %v701_v26, %v149_v23 }
  0xc6   :  { %v152_v24 = vpop.f32.mrf.mxu1 }
  0xc7   :  { %v153_v30 = vadd.f32 %v701_v26, %v152_v24 }
  0xce   :  { %v155_v25 = vpop.f32.mrf.mxu1 }
  0xcf   :  { %v156_v29 = vadd.f32 %v701_v26, %v155_v25 }
  0xd6   :  { %v158_v27 = vpop.f32.mrf.mxu1 }
  0xd7   :  { %v159_v28 = vadd.f32 %v701_v26, %v158_v27  ;;  %v164_v26 = vld [vmem:[%s1085_s5 + $0x18] sm:$0xff]  ;;  %v163_v27 = vld [vmem:[%s1085_s5 + $0x10] sm:$0xff] }
  0xd8   :  { %181 = vmatpush.msrb.mxu2 %v164_v26 }
  0xd9   :  { %664 = vmatpush.xpose.msk.msra.mxu3 %vm218_vm1, %v159_v28  ;;  %v162_v28 = vld [vmem:[%s1085_s5 + $0x8] sm:$0xff] }
  0xda   :  { %182 = vmatpush.msrb.mxu2 %v163_v27 }
  0xdc   :  { %183 = vmatpush.msrb.mxu2 %v162_v28 }
  0xdd   :  { %665 = vmatpush.xpose.msk.msra.mxu3 %vm218_vm1, %v156_v29  ;;  %v161_v29 = vld [vmem:[%s1085_s5] sm:$0xff] }
  0xde   :  { %184 = vmatpush.msrb.mxu2 %v161_v29 }
  0xdf   :  { %656 = vmatmul.msk.f32.vlgmr.msrb.gmra.mxu2 %vm46_vm0, %v832_v6 }
  0xe1   :  { %666 = vmatpush.xpose.msk.msra.mxu3 %vm218_vm1, %v153_v30 }
  0xe5   :  { %667 = vmatpush.xpose.msk.msra.mxu3 %vm218_vm1, %v150_v31 }
  0xe7   :  { %657 = vmatmul.msk.f32.gmra.mxu2 %vm46_vm0, %v855_v11 }
  0xe9   :  { %668 = vmatpush.xpose.msk.msra.mxu3 %vm218_vm1, %v147_v32 }
  0xed   :  { %669 = vmatpush.xpose.msk.msra.mxu3 %vm218_vm1, %v144_v33 }
  0xef   :  { %658 = vmatmul.msk.f32.gmra.mxu2 %vm46_vm0, %v869_v13 }
  0xf1   :  { %670 = vmatpush.xpose.msk.msra.mxu3 %vm218_vm1, %v141_v35 }
  0xf5   :  { %671 = vmatpush.xpose.msk.msra.mxu3 %vm218_vm1, %v138_v37 }
  0xf7   :  { %659 = vmatmul.msk.f32.gmra.mxu2 %vm46_vm0, %v824_v4 }
  0xf8   :  { %672 = vmatmul.msk.f32.vlgmr.msra.gmra.mxu3 %vm218_vm1, %v89_v38 }
  0xff   :  { %660 = vmatmul.msk.f32.gmra.mxu2 %vm46_vm0, %v850_v10 }
 0x100   :  { %673 = vmatmul.msk.f32.gmra.mxu3 %vm218_vm1, %v92_v40 }
 0x107   :  { %661 = vmatmul.msk.f32.gmra.mxu2 %vm46_vm0, %v864_v12 }
 0x108   :  { %674 = vmatmul.msk.f32.gmra.mxu3 %vm218_vm1, %v95_v42 }
 0x10f   :  { %662 = vmatmul.msk.f32.gmra.mxu2 %vm46_vm0, %v882_v14 }
 0x110   :  { %675 = vmatmul.msk.f32.gmra.mxu3 %vm218_vm1, %v98_v43 }
 0x117   :  { %663 = vmatmul.msk.f32.gmra.mxu2 %vm46_vm0, %v891_v15 }
 0x118   :  { %676 = vmatmul.msk.f32.gmra.mxu3 %vm218_vm1, %v101_v44 }
 0x120   :  { %677 = vmatmul.msk.f32.gmra.mxu3 %vm218_vm1, %v104_v45 }
 0x128   :  { %678 = vmatmul.msk.f32.gmra.mxu3 %vm218_vm1, %v107_v47 }
 0x130   :  { %679 = vmatmul.msk.f32.gmra.mxu3 %vm218_vm1, %v110_v49 }
 0x17b   :  { %v284_v51 = vpop.f32.mrf.mxu3 }
 0x17c   :  { %v285_v52 = vadd.f32 %v284_v51, %v210_v50 }
 0x17e   :  { %v309_v53 = vsel %vm308_vm2, %v285_v52, -inf }
 0x17f   :  { %310 = vmax.xlane.f32.xlu0 %v309_v53 }
 0x183   :  { %v287_v55 = vpop.f32.mrf.mxu3 }
 0x184   :  { %v288_v56 = vadd.f32 %v287_v55, %v211_v54 }
 0x186   :  { %v312_v57 = vsel %vm308_vm2, %v288_v56, -inf }
 0x187   :  { %313 = vmax.xlane.f32.xlu0 %v312_v57 }
 0x18b   :  { %v290_v59 = vpop.f32.mrf.mxu3 }
 0x18c   :  { %v291_v60 = vadd.f32 %v290_v59, %v212_v58 }
 0x18e   :  { %v315_v61 = vsel %vm308_vm2, %v291_v60, -inf }
 0x18f   :  { %316 = vmax.xlane.f32.xlu1 %v315_v61 }
 0x193   :  { %v293_v63 = vpop.f32.mrf.mxu3 }
 0x194   :  { %v294_v0 = vadd.f32 %v293_v63, %v213_v62 }
 0x196   :  { %v318_v1 = vsel %vm308_vm2, %v294_v0, -inf }
 0x197   :  { %319 = vmax.xlane.f32.xlu1 %v318_v1 }
 0x19b   :  { %v296_v3 = vpop.f32.mrf.mxu3 }
 0x19c   :  { %v297_v5 = vadd.f32 %v296_v3, %v214_v2 }
 0x19e   :  { %v321_v7 = vsel %vm308_vm2, %v297_v5, -inf }
 0x19f   :  { %322 = vmax.xlane.f32.xlu2 %v321_v7 }
 0x1a3   :  { %v299_v9 = vpop.f32.mrf.mxu3 }
 0x1a4   :  { %v300_v16 = vadd.f32 %v299_v9, %v215_v8 }
 0x1a6   :  { %v324_v17 = vsel %vm308_vm2, %v300_v16, -inf }
 0x1a7   :  { %325 = vmax.xlane.f32.xlu2 %v324_v17 }
 0x1ab   :  { %v302_v19 = vpop.f32.mrf.mxu3 }
 0x1ac   :  { %v954_v20 = vadd.f32 %v302_v19, %v216_v18 }
 0x1ae   :  { %v327_v21 = vsel %vm308_vm2, %v954_v20, -inf }
 0x1af   :  { %328 = vmax.xlane.f32.xlu0 %v327_v21 }
 0x1b3   :  { %v305_v23 = vpop.f32.mrf.mxu3 }
 0x1b4   :  { %v961_v24 = vadd.f32 %v305_v23, %v217_v22 }
 0x1b6   :  { %v330_v25 = vsel %vm308_vm2, %v961_v24, -inf }
 0x1b7   :  { %331 = vmax.xlane.f32.xlu1 %v330_v25 }
 0x1f2   :  { %v311_v30 = vpop.xlane.xlu0 %310 }
 0x1f3   :  { %v333_v31 = vsub.f32 %v285_v52, %v311_v30 }
 0x1f5   :  { %v341_v32 = vmul.f32 1.442695, %v333_v31 }
 0x1f7   :  { %703 = vpow2.f32 %v341_v32 }
 0x1fa   :  { %v314_v33 = vpop.xlane.xlu0 %313 }
 0x1fb   :  { %v334_v34 = vsub.f32 %v288_v56, %v314_v33 }
 0x1fd   :  { %v979_v35 = vpop.eup %703  ;;  %v343_v36 = vmul.f32 1.442695, %v334_v34 }
 0x1fe   :  { %v357_v37 = vsel %vm308_vm2, %v979_v35, 0.0 }
 0x1ff   :  { %705 = vpow2.f32 %v343_v36  ;;  %358 = vadd.xlane.f32.xlu2 %v357_v37 }
 0x202   :  { %v317_v38 = vpop.xlane.xlu1 %316 }
 0x203   :  { %v335_v39 = vsub.f32 %v291_v60, %v317_v38 }
 0x205   :  { %v985_v40 = vpop.eup %705  ;;  %v345_v41 = vmul.f32 1.442695, %v335_v39 }
 0x206   :  { %v360_v42 = vsel %vm308_vm2, %v985_v40, 0.0 }
 0x207   :  { %707 = vpow2.f32 %v345_v41  ;;  %361 = vadd.xlane.f32.xlu0 %v360_v42 }
 0x20a   :  { %v320_v43 = vpop.xlane.xlu1 %319 }
 0x20b   :  { %v336_v44 = vsub.f32 %v294_v0, %v320_v43 }
 0x20d   :  { %v991_v45 = vpop.eup %707  ;;  %v347_v46 = vmul.f32 1.442695, %v336_v44 }
 0x20e   :  { %v363_v47 = vsel %vm308_vm2, %v991_v45, 0.0 }
 0x20f   :  { %709 = vpow2.f32 %v347_v46  ;;  %364 = vadd.xlane.f32.xlu1 %v363_v47 }
 0x212   :  { %v323_v48 = vpop.xlane.xlu2 %322 }
 0x213   :  { %v337_v49 = vsub.f32 %v297_v5, %v323_v48 }
 0x215   :  { %v997_v50 = vpop.eup %709  ;;  %v349_v51 = vmul.f32 1.442695, %v337_v49 }
 0x216   :  { %v366_v52 = vsel %vm308_vm2, %v997_v50, 0.0 }
 0x217   :  { %711 = vpow2.f32 %v349_v51  ;;  %367 = vadd.xlane.f32.xlu2 %v366_v52 }
 0x21a   :  { %v326_v53 = vpop.xlane.xlu2 %325 }
 0x21b   :  { %v338_v54 = vsub.f32 %v300_v16, %v326_v53 }
 0x21d   :  { %v1003_v55 = vpop.eup %711  ;;  %v351_v56 = vmul.f32 1.442695, %v338_v54 }
 0x21e   :  { %v369_v57 = vsel %vm308_vm2, %v1003_v55, 0.0 }
 0x21f   :  { %713 = vpow2.f32 %v351_v56  ;;  %370 = vadd.xlane.f32.xlu0 %v369_v57 }
 0x222   :  { %v329_v58 = vpop.xlane.xlu0 %328 }
 0x223   :  { %v339_v59 = vsub.f32 %v954_v20, %v329_v58  ;;  %v1027_v20 = vpop.f32.mrf.mxu2 }
 0x225   :  { %v1010_v60 = vpop.eup %713  ;;  %v353_v61 = vmul.f32 1.442695, %v339_v59 }
 0x226   :  { %v372_v62 = vsel %vm308_vm2, %v1010_v60, 0.0 }
 0x227   :  { %715 = vpow2.f32 %v353_v61  ;;  %373 = vadd.xlane.f32.xlu1 %v372_v62 }
 0x22a   :  { %v332_v63 = vpop.xlane.xlu1 %331 }
 0x22b   :  { %v340_v0 = vsub.f32 %v961_v24, %v332_v63  ;;  %v1030_v36 = vpop.f32.mrf.mxu2 }
 0x22d   :  { %v1017_v1 = vpop.eup %715  ;;  %v355_v2 = vmul.f32 1.442695, %v340_v0 }
 0x22e   :  { %v375_v3 = vsel %vm308_vm2, %v1017_v1, 0.0 }
 0x22f   :  { %717 = vpow2.f32 %v355_v2  ;;  %376 = vadd.xlane.f32.xlu2 %v375_v3 }
 0x233   :  { %v1033_v52 = vpop.f32.mrf.mxu2 }
 0x235   :  { %v1023_v5 = vpop.eup %717 }
 0x236   :  { %v378_v7 = vsel %vm308_vm2, %v1023_v5, 0.0 }
 0x237   :  { %379 = vadd.xlane.f32.xlu0 %v378_v7 }
 0x23b   :  { %v1036_v7 = vpop.f32.mrf.mxu2 }
 0x272   :  { %v359_v8 = vpop.xlane.xlu2 %358 }
 0x273   :  { %v381_v9 = vmul.f32 4.0, %v359_v8 }
 0x275   :  { %719 = vrcp.f32 %v381_v9  ;;  %v400_v22 = vand.u32 2147483648, %v381_v9  ;;  %v398_v24 = vand.u32 2147483647, %v381_v9  ;;  %vm394_vm4 = vweird.f32 %v381_v9 }
 0x277   :  { %v401_v29 = vor.u32 1.1754944e-38, %v400_v22  ;;  %vm399_vm6 = vcmp.eq.f32.partialorder %v398_v24, 8.507059e+37 }
 0x27a   :  { %v362_v16 = vpop.xlane.xlu0 %361 }
 0x27b   :  { %v720_v17 = vpop.eup %719  ;;  %v382_v18 = vmul.f32 4.0, %v362_v16 }
 0x27c   :  { %v390_v19 = vmul.f32 %v720_v17, %v381_v9  ;;  %vm395_vm3 = vweird.f32 %v720_v17 }
 0x27d   :  { %721 = vrcp.f32 %v382_v18  ;;  %vm396_vm5 = vmor %vm394_vm4, %vm395_vm3  ;;  %v414_v37 = vand.u32 2147483648, %v382_v18  ;;  %v412_v39 = vand.u32 2147483647, %v382_v18  ;;  %vm408_vm8 = vweird.f32 %v382_v18 }
 0x27e   :  { %v391_v21 = vsub.f32 1.0, %v390_v19 }
 0x27f   :  { %v415_v46 = vor.u32 1.1754944e-38, %v414_v37  ;;  %vm413_vm10 = vcmp.eq.f32.partialorder %v412_v39, 8.507059e+37 }
 0x280   :  { %v392_v23 = vmul.f32 %v720_v17, %v391_v21 }
 0x282   :  { %v365_v25 = vpop.xlane.xlu1 %364  ;;  %v393_v26 = vadd.f32 %v720_v17, %v392_v23 }
 0x283   :  { %v722_v27 = vpop.eup %721  ;;  %v383_v28 = vmul.f32 4.0, %v365_v25 }
 0x284   :  { %v404_v30 = vmul.f32 %v722_v27, %v382_v18  ;;  %v397_v31 = vsel %vm396_vm5, %v720_v17, %v393_v26  ;;  %vm409_vm7 = vweird.f32 %v722_v27 }
 0x285   :  { %723 = vrcp.f32 %v383_v28  ;;  %v402_v32 = vsel %vm399_vm6, %v401_v29, %v397_v31  ;;  %vm410_vm9 = vmor %vm408_vm8, %vm409_vm7  ;;  %v428_v53 = vand.u32 2147483648, %v383_v28  ;;  %v426_v56 = vand.u32 2147483647, %v383_v28 }
 0x286   :  { %v405_v33 = vsub.f32 1.0, %v404_v30  ;;  %v501_v34 = vmul.f32 %v979_v35, %v402_v32  ;;  %vm422_vm12 = vweird.f32 %v383_v28 }
 0x287   :  { %v429_v62 = vor.u32 1.1754944e-38, %v428_v53  ;;  %vm427_vm14 = vcmp.eq.f32.partialorder %v426_v56, 8.507059e+37 }
 0x288   :  { %509 = vxpose.xlu1.b32.start [1/8] (short) (narrow) %v501_v34, 64  ;;  %v406_v38 = vmul.f32 %v722_v27, %v405_v33 }
 0x28a   :  { %v368_v41 = vpop.xlane.xlu2 %367  ;;  %v407_v42 = vadd.f32 %v722_v27, %v406_v38 }
 0x28b   :  { %v724_v43 = vpop.eup %723  ;;  %v384_v44 = vmul.f32 4.0, %v368_v41 }
 0x28c   :  { %v418_v47 = vmul.f32 %v724_v43, %v383_v28  ;;  %v411_v48 = vsel %vm410_vm9, %v722_v27, %v407_v42  ;;  %vm423_vm11 = vweird.f32 %v724_v43  ;;  %v1039_v27 = vpop.f32.mrf.mxu2 }
 0x28d   :  { %725 = vrcp.f32 %v384_v44  ;;  %v416_v49 = vsel %vm413_vm10, %v415_v46, %v411_v48  ;;  %vm424_vm13 = vmor %vm422_vm12, %vm423_vm11  ;;  %v442_v8 = vand.u32 2147483648, %v384_v44  ;;  %v440_v16 = vand.u32 2147483647, %v384_v44 }
 0x28e   :  { %v419_v35 = vsub.f32 1.0, %v418_v47  ;;  %v502_v51 = vmul.f32 %v985_v40, %v416_v49  ;;  %vm436_vm1 = vweird.f32 %v384_v44 }
 0x28f   :  { %v443_v22 = vor.u32 1.1754944e-38, %v442_v8  ;;  %vm441_vm4 = vcmp.eq.f32.partialorder %v440_v16, 8.507059e+37 }
 0x290   :  { %510 = vxpose.xlu1.b32.cont [2/8] (short) (narrow) %v502_v51, 64  ;;  %v420_v54 = vmul.f32 %v724_v43, %v419_v35 }
 0x292   :  { %v371_v57 = vpop.xlane.xlu0 %370  ;;  %v421_v58 = vadd.f32 %v724_v43, %v420_v54 }
 0x293   :  { %v726_v59 = vpop.eup %725  ;;  %v385_v61 = vmul.f32 4.0, %v371_v57 }
 0x294   :  { %v432_v63 = vmul.f32 %v726_v59, %v384_v44  ;;  %v425_v0 = vsel %vm424_vm13, %v724_v43, %v421_v58  ;;  %vm437_vm15 = vweird.f32 %v726_v59  ;;  %v201_v43 = vpop.f32.mrf.mxu2 }
 0x295   :  { %727 = vrcp.f32 %v385_v61  ;;  %v430_v2 = vsel %vm427_vm14, %v429_v62, %v425_v0  ;;  %vm438_vm3 = vmor %vm436_vm1, %vm437_vm15  ;;  %v456_v28 = vand.u32 2147483648, %v385_v61  ;;  %v454_v30 = vand.u32 2147483647, %v385_v61 }
 0x296   :  { %v433_v40 = vsub.f32 1.0, %v432_v63  ;;  %v503_v3 = vmul.f32 %v991_v45, %v430_v2  ;;  %vm450_vm6 = vweird.f32 %v385_v61 }
 0x297   :  { %v457_v37 = vor.u32 1.1754944e-38, %v456_v28  ;;  %vm455_vm8 = vcmp.eq.f32.partialorder %v454_v30, 8.507059e+37 }
 0x298   :  { %511 = vxpose.xlu1.b32.cont [3/8] (short) (narrow) %v503_v3, 64  ;;  %v434_v9 = vmul.f32 %v726_v59, %v433_v40  ;;  %v702_v40 = vld [vmem:[%s1086_s6] ss:$0 sm:$0xff]  ;;  %s761_s6 = smov [#allocation2]  }
 0x299   :  { %s626_s13 = sshll.u32 %s761_s6, 4  ;;  %s627_s13 = int_to_ptr.vmem [resolvable:$true] %s626_s13 }
 0x29a   :  { %v374_v17 = vpop.xlane.xlu1 %373  ;;  %v435_v18 = vadd.f32 %v726_v59, %v434_v9 }
 0x29b   :  { %v728_v19 = vpop.eup %727  ;;  %v386_v21 = vmul.f32 4.0, %v374_v17 }
 0x29c   :  { %v446_v23 = vmul.f32 %v728_v19, %v385_v61  ;;  %v439_v24 = vsel %vm438_vm3, %v726_v59, %v435_v18  ;;  %vm451_vm5 = vweird.f32 %v728_v19  ;;  %v204_v59 = vpop.f32.mrf.mxu2 }
 0x29d   :  { %729 = vrcp.f32 %v386_v21  ;;  %v444_v25 = vsel %vm441_vm4, %v443_v22, %v439_v24  ;;  %vm452_vm7 = vmor %vm450_vm6, %vm451_vm5  ;;  %v470_v44 = vand.u32 2147483648, %v386_v21  ;;  %v468_v47 = vand.u32 2147483647, %v386_v21 }
 0x29e   :  { %v447_v45 = vsub.f32 1.0, %v446_v23  ;;  %v504_v26 = vmul.f32 %v997_v50, %v444_v25  ;;  %vm464_vm10 = vweird.f32 %v386_v21  ;;  %v202_v25 = vadd.f32 %v702_v40, %v201_v43 }
 0x29f   :  { %v471_v53 = vor.u32 1.1754944e-38, %v470_v44  ;;  %vm469_vm12 = vcmp.eq.f32.partialorder %v468_v47, 8.507059e+37 }
 0x2a0   :  { %512 = vxpose.xlu1.b32.cont [4/8] (short) (narrow) %v504_v26, 64  ;;  %v448_v29 = vmul.f32 %v728_v19, %v447_v45  ;;  %v199_v26 = vadd.f32 %v702_v40, %v1039_v27  ;;  %v187_v27 = vadd.f32 %v702_v40, %v1027_v20 }
 0x2a2   :  { %v377_v31 = vpop.xlane.xlu2 %376  ;;  %v449_v32 = vadd.f32 %v728_v19, %v448_v29 }
 0x2a3   :  { %v730_v33 = vpop.eup %729  ;;  %v387_v34 = vmul.f32 4.0, %v377_v31 }
 0x2a4   :  { %v460_v38 = vmul.f32 %v730_v33, %v386_v21  ;;  %v453_v39 = vsel %vm452_vm7, %v728_v19, %v449_v32  ;;  %vm465_vm9 = vweird.f32 %v730_v33  ;;  %v207_v18 = vpop.f32.mrf.mxu2  ;;  %v205_v21 = vadd.f32 %v702_v40, %v204_v59 }
 0x2a5   :  { %731 = vrcp.f32 %v387_v34  ;;  %v458_v41 = vsel %vm455_vm8, %v457_v37, %v453_v39  ;;  %vm466_vm11 = vmor %vm464_vm10, %vm465_vm9  ;;  %v484_v61 = vand.u32 2147483648, %v387_v34  ;;  %v482_v63 = vand.u32 2147483647, %v387_v34 }
 0x2a6   :  { %v461_v50 = vsub.f32 1.0, %v460_v38  ;;  %v505_v42 = vmul.f32 %v1003_v55, %v458_v41  ;;  %vm478_vm14 = vweird.f32 %v387_v34  ;;  %v208_v22 = vadd.f32 %v702_v40, %v207_v18 }
 0x2a7   :  { %v485_v3 = vor.u32 1.1754944e-38, %v484_v61  ;;  %vm483_vm1 = vcmp.eq.f32.partialorder %v482_v63, 8.507059e+37  ;;  %v193_v32 = vadd.f32 %v702_v40, %v1033_v52 }
 0x2a8   :  { %513 = vxpose.xlu1.b32.cont [5/8] (short) (narrow) %v505_v42, 64  ;;  %v462_v46 = vmul.f32 %v730_v33, %v461_v50  ;;  %573 = vmatpush.msrb.mxu0 %v208_v22 }
 0x2aa   :  { %v380_v48 = vpop.xlane.xlu0 %379  ;;  %v463_v49 = vadd.f32 %v730_v33, %v462_v46  ;;  %574 = vmatpush.msrb.mxu0 %v205_v21 }
 0x2ab   :  { %v732_v35 = vpop.eup %731  ;;  %v388_v51 = vmul.f32 4.0, %v380_v48 }
 0x2ac   :  { %v474_v54 = vmul.f32 %v732_v35, %v387_v34  ;;  %v467_v56 = vsel %vm466_vm11, %v730_v33, %v463_v49  ;;  %vm479_vm13 = vweird.f32 %v732_v35  ;;  %575 = vmatpush.msrb.mxu0 %v202_v25  ;;  %v190_v33 = vadd.f32 %v702_v40, %v1030_v36 }
 0x2ad   :  { %733 = vrcp.f32 %v388_v51  ;;  %v472_v57 = vsel %vm469_vm12, %v471_v53, %v467_v56  ;;  %vm480_vm15 = vmor %vm478_vm14, %vm479_vm13  ;;  %v498_v19 = vand.u32 2147483648, %v388_v51  ;;  %v496_v24 = vand.u32 2147483647, %v388_v51 }
 0x2ae   :  { %v475_v58 = vsub.f32 1.0, %v474_v54  ;;  %v506_v55 = vmul.f32 %v1010_v60, %v472_v57  ;;  %vm492_vm4 = vweird.f32 %v388_v51  ;;  %576 = vmatpush.msrb.mxu0 %v199_v26 }
 0x2af   :  { %v499_v28 = vor.u32 1.1754944e-38, %v498_v19  ;;  %vm497_vm6 = vcmp.eq.f32.partialorder %v496_v24, 8.507059e+37 }
 0x2b0   :  { %514 = vxpose.xlu1.b32.cont [6/8] (short) (narrow) %v506_v55, 64  ;;  %v476_v62 = vmul.f32 %v732_v35, %v475_v58 }
 0x2b2   :  { %v477_v0 = vadd.f32 %v732_v35, %v476_v62 }
 0x2b3   :  { %v734_v2 = vpop.eup %733 }
 0x2b4   :  { %v488_v8 = vmul.f32 %v734_v2, %v388_v51  ;;  %v481_v9 = vsel %vm480_vm15, %v732_v35, %v477_v0  ;;  %vm493_vm3 = vweird.f32 %v734_v2 }
 0x2b5   :  { %v486_v16 = vsel %vm483_vm1, %v485_v3, %v481_v9  ;;  %vm494_vm5 = vmor %vm492_vm4, %vm493_vm3 }
 0x2b6   :  { %v489_v60 = vsub.f32 1.0, %v488_v8  ;;  %v507_v17 = vmul.f32 %v1017_v1, %v486_v16  ;;  %v196_v1 = vadd.f32 %v702_v40, %v1036_v7 }
 0x2b8   :  { %515 = vxpose.xlu1.b32.cont [7/8] (short) (narrow) %v507_v17, 64  ;;  %v490_v23 = vmul.f32 %v734_v2, %v489_v60  ;;  %577 = vmatpush.msrb.mxu0 %v196_v1 }
 0x2ba   :  { %v491_v45 = vadd.f32 %v734_v2, %v490_v23  ;;  %578 = vmatpush.msrb.mxu0 %v193_v32 }
 0x2bc   :  { %v495_v29 = vsel %vm494_vm5, %v734_v2, %v491_v45  ;;  %579 = vmatpush.msrb.mxu0 %v190_v33 }
 0x2bd   :  { %v500_v30 = vsel %vm497_vm6, %v499_v28, %v495_v29 }
 0x2be   :  { %v508_v31 = vmul.f32 %v1023_v5, %v500_v30  ;;  %580 = vmatpush.msrb.mxu0 %v187_v27 }
 0x2c0   :  { %516 = vxpose.xlu1.b32.end [8/8] (short) (narrow) %v508_v31, 64 }
 0x32c   :  { %v525_v34 = vpop.trf.xlu1 }
 0x32d   :  { %680 = vmatmul.msk.f32.vlgmr.msrb.gmra.mxu0 %vm308_vm2, %v525_v34 }
 0x334   :  { %v526_v7 = vpop.trf.xlu1 }
 0x335   :  { %681 = vmatmul.msk.f32.gmra.mxu0 %vm308_vm2, %v526_v7 }
 0x33c   :  { %v527_v37 = vpop.trf.xlu1 }
 0x33d   :  { %682 = vmatmul.msk.f32.gmra.mxu0 %vm308_vm2, %v527_v37 }
 0x344   :  { %v528_v5 = vpop.trf.xlu1 }
 0x345   :  { %683 = vmatmul.msk.f32.gmra.mxu0 %vm308_vm2, %v528_v5 }
 0x34c   :  { %v529_v52 = vpop.trf.xlu1 }
 0x34d   :  { %684 = vmatmul.msk.f32.gmra.mxu0 %vm308_vm2, %v529_v52 }
 0x354   :  { %v530_v36 = vpop.trf.xlu1 }
 0x355   :  { %685 = vmatmul.msk.f32.gmra.mxu0 %vm308_vm2, %v530_v36 }
 0x35c   :  { %v531_v20 = vpop.trf.xlu1 }
 0x35d   :  { %686 = vmatmul.msk.f32.gmra.mxu0 %vm308_vm2, %v531_v20 }
 0x364   :  { %v532_v38 = vpop.trf.xlu1 }
 0x365   :  { %687 = vmatmul.msk.f32.gmra.mxu0 %vm308_vm2, %v532_v38 }
 0x3aa   :  { %v582_v39 = vpop.f32.mrf.mxu0 }
 0x3ab   :  { %v606_v41 = vadd.f32 %v582_v39, %v832_v6 }
 0x3ad   :  { %614 = vst.msk [vmem:[#allocation2] sm:$0xff] %vm46_vm0, %v606_v41 }
 0x3b2   :  { %v585_v50 = vpop.f32.mrf.mxu0 }
 0x3b3   :  { %v607_v42 = vadd.f32 %v585_v50, %v855_v11 }
 0x3b5   :  { %615 = vst.msk [vmem:[#allocation2 + $0x8] sm:$0xff] %vm46_vm0, %v607_v42 }
 0x3ba   :  { %v588_v43 = vpop.f32.mrf.mxu0 }
 0x3bb   :  { %v608_v44 = vadd.f32 %v588_v43, %v869_v13 }
 0x3bd   :  { %616 = vst.msk [vmem:[#allocation2 + $0x10] sm:$0xff] %vm46_vm0, %v608_v44 }
 0x3c2   :  { %v591_v46 = vpop.f32.mrf.mxu0 }
 0x3c3   :  { %v609_v47 = vadd.f32 %v591_v46, %v824_v4 }
 0x3c5   :  { %617 = vst.msk [vmem:[#allocation2 + $0x18] sm:$0xff] %vm46_vm0, %v609_v47 }
 0x3ca   :  { %v594_v48 = vpop.f32.mrf.mxu0 }
 0x3cb   :  { %v610_v6 = vadd.f32 %v594_v48, %v850_v10 }
 0x3cd   :  { %618 = vst.msk [vmem:[#allocation2 + $0x20] sm:$0xff] %vm46_vm0, %v610_v6 }
 0x3d2   :  { %v597_v49 = vpop.f32.mrf.mxu0 }
 0x3d3   :  { %v611_v11 = vadd.f32 %v597_v49, %v864_v12 }
 0x3d5   :  { %619 = vst.msk [vmem:[#allocation2 + $0x28] sm:$0xff] %vm46_vm0, %v611_v11 }
 0x3da   :  { %v600_v35 = vpop.f32.mrf.mxu0 }
 0x3db   :  { %v612_v13 = vadd.f32 %v600_v35, %v882_v14 }
 0x3dd   :  { %620 = vst.msk [vmem:[#allocation2 + $0x30] sm:$0xff] %vm46_vm0, %v612_v13 }
 0x3e2   :  { %v603_v4 = vpop.f32.mrf.mxu0 }
 0x3e3   :  { %v613_v10 = vadd.f32 %v603_v4, %v891_v15 }
 0x3e5   :  { %621 = vst.msk [vmem:[#allocation2 + $0x38] sm:$0xff] %vm46_vm0, %v613_v10 }
 0x3e6   :  { %634 = dma.vmem_to_hbm [thread:$0]  %s627_s13, 1024, %s629_s2, [#allocation3], %s762_s15, %s762_s15, %s763_s16  }
 0x3e7   :  { %759 = dma.done.wait [#allocation3], 1024  }
 0x3e8   :  { %760 = vsyncadd [#allocation3], 4294966272 }
 0x3e9   :  { %639 = vsyncpa [#allocation3], 1 }

</bundles_post_ra>
